<compile_context>
chip_gen: v6e
topology: v6e:2x2x1
jax: 0.10.0
libtpu: 0.0.40
codegen_flags: <defaults>
</compile_context>

<pallas_src>
import jax
import jax.numpy as jnp
from jax.experimental import pallas as pl

# --- model hyper-parameters (small, consistent with the module) -------------
EMBED = 32
HEADS = 4
HEAD_DIM = EMBED // HEADS          # 8
WINDOW = 4
FWD_EXP = 2
HIDDEN = FWD_EXP * EMBED           # 64
SEQ = 8
BATCH = 2
EPS = 1e-5
# TODO(synk): the original PyTorch module references self.overlap_size but never
# defines it (forward would raise AttributeError); we fix it to window_size // 2.
OVERLAP = WINDOW // 2

NS = BATCH * SEQ                   # 16 (n, s) rows
NB = HEADS * BATCH                 # 8  attention batch (head-major)
ROWS = HEADS * BATCH * SEQ         # 64 activation rows, ordered (h, n, s)
INV_SCALE = 1.0 / (float(EMBED) ** 0.5)   # original scales by sqrt(embed_size)

# activation tile column layout (one (64, 128) f32 array)
X_LANES = 128
_C_V = 0                           # cols  0: 8  per-head value input
_C_K = HEAD_DIM                    # cols  8:16  per-head key input
_C_Q = 2 * HEAD_DIM                # cols 16:24  per-head query input
_C_BIAS = 3 * HEAD_DIM             # cols 24:32  pre-scaled additive bias row
_C_QIN = 32                        # cols 32:64  original query (rows 0:NS only)

# packed-parameter row layout (one (264, 64) f32 array)
_R_PROJ = 0                        # rows   0:128, cols 0:24 zero-padded blockdiag(WvT,WkT,WqT/sqrt(E))
_R_FC = X_LANES                    # rows 128:160, cols 0:32 fc_out weight^T
_R_W1 = _R_FC + EMBED              # rows 160:192, cols 0:64 ffn weight1^T
_R_W2 = _R_W1 + EMBED              # rows 192:256, cols 0:32 ffn weight2^T
_R_VEC = _R_W2 + HIDDEN            # rows 256:264 packed vectors
_P_ROWS = _R_VEC + 8               # 264
_P_COLS = 64


def _layer_norm(x, gamma, beta):
    # two INDEPENDENT reductions (issue back-to-back); var = E[x^2] - mu^2.
    # Cancellation is negligible at E=32 with normalized-scale f32 activations.
    mu = jnp.mean(x, axis=-1, keepdims=True)
    msq = jnp.mean(x * x, axis=-1, keepdims=True)
    var = msq - mu * mu
    return (x - mu) * jax.lax.rsqrt(var + EPS) * gamma + beta


def transformer_block_kernel(x_ref, p_ref, o_ref):
    x = x_ref[...]                                   # (64, 128), rows = (h, n, s)

    # fused V/K/Q projection: ONE (64,128)x(128,24) matmul.  The weight rows
    # facing the bias / residual-query / pad lanes are zero, so the full
    # 128-lane tile feeds the MXU with no input slice.  Wq is pre-scaled by
    # 1/sqrt(embed) in pack_params.
    proj = jnp.dot(x, p_ref[_R_PROJ:_R_PROJ + X_LANES, 0:3 * HEAD_DIM],
                   preferred_element_type=jnp.float32)        # (64, 24)

    v3 = proj[:, _C_V:_C_V + HEAD_DIM].reshape(NB, SEQ, HEAD_DIM)
    k3 = proj[:, _C_K:_C_K + HEAD_DIM].reshape(NB, SEQ, HEAD_DIM)
    q3 = proj[:, _C_Q:_C_Q + HEAD_DIM].reshape(NB, SEQ, HEAD_DIM)

    # additive bias (already * 1/sqrt(E)): -1e20*scale on masked QUERY rows
    # (same fill/broadcast semantics as the reference masked_fill) plus a
    # -1e30*scale band outside the local window+overlap key range.  Same rows
    # for every head; f32 absorption reproduces the reference's uniform
    # softmax on fully-masked query rows.
    bias = x[:, _C_BIAS:_C_BIAS + SEQ].reshape(NB, SEQ, SEQ)

    # head-batched attention: ONE softmax chain over all heads.
    e = jnp.einsum('bqd,bkd->bqk', q3, k3,
                   preferred_element_type=jnp.float32) + bias  # (8, 8, 8)
    e = e - jnp.max(e, axis=-1, keepdims=True)
    p = jnp.exp(e)
    # approx=True uses the EUP slot (free here); switch to approx=False for
    # bit-tight parity with the PyTorch reference.
    a = p * pl.reciprocal(jnp.sum(p, axis=-1, keepdims=True), approx=True)
    o3 = jnp.einsum('bqk,bkd->bqd', a, v3,
                    preferred_element_type=jnp.float32)        # (8, 8, 8)
    o_flat = o3.reshape(HEADS * NS, HEAD_DIM)                  # rows (h, n, s)

    # parameter slices (sublane / small lane slices of the packed array)
    wfc = p_ref[_R_FC:_R_FC + EMBED, 0:EMBED]                  # (32, 32)
    vecs = p_ref[_R_VEC:_R_VEC + 8, :]                         # (8, 64)
    bfc = vecs[0:1, 0:EMBED]
    g1, b1 = vecs[1:2, 0:EMBED], vecs[2:3, 0:EMBED]
    bb1 = vecs[3:4, 0:HIDDEN]
    bb2 = vecs[4:5, 0:EMBED]
    g2, b2 = vecs[5:6, 0:EMBED], vecs[6:7, 0:EMBED]

    # fc_out with the head-concat folded in: 4 independent per-head partial
    # matmuls (contiguous sublane slices only), combined with a tree add.
    parts = [
        jnp.dot(o_flat[h * NS:(h + 1) * NS, :],
                wfc[h * HEAD_DIM:(h + 1) * HEAD_DIM, :],
                preferred_element_type=jnp.float32)
        for h in range(HEADS)
    ]
    attn = (parts[0] + parts[1]) + (parts[2] + parts[3]) + bfc  # (16, 32)

    # residual + LayerNorm1 (dropout = identity in eval mode)
    q_in = x[0:NS, _C_QIN:_C_QIN + EMBED]                       # original query
    x1 = _layer_norm(attn + q_in, g1, b1)

    # feed-forward: Linear -> ReLU -> Linear (batch folded into rows)
    h1 = jnp.maximum(
        jnp.dot(x1, p_ref[_R_W1:_R_W1 + EMBED, 0:HIDDEN],
                preferred_element_type=jnp.float32) + bb1, 0.0)
    ff = jnp.dot(h1, p_ref[_R_W2:_R_W2 + HIDDEN, 0:EMBED],
                 preferred_element_type=jnp.float32) + bb2

    # residual + LayerNorm2 (dropout = identity); single contiguous 2-D store
    o_ref[...] = _layer_norm(ff + x1, g2, b2)


def transformer_block(value, key, query, mask, packed_params):
    N, S, E = query.shape

    def head_major_rows(t):
        # (N, S, E) -> rows ordered (head, batch, seq), head_dim columns
        return jnp.transpose(t.reshape(N, S, HEADS, HEAD_DIM),
                             (2, 0, 1, 3)).reshape(HEADS * N * S, HEAD_DIM)

    # additive attention bias, pre-scaled by 1/sqrt(embed) (scale folded here
    # and into Wq host-side, none in the kernel).  Keep this path f32-only.
    q_idx = jnp.arange(S)[:, None]
    k_idx = jnp.arange(S)[None, :]
    w_start = (q_idx // WINDOW) * WINDOW
    in_band = ((k_idx >= jnp.maximum(w_start - OVERLAP, 0)) &
               (k_idx < jnp.minimum(w_start + WINDOW + OVERLAP, S)))
    band_bias = jnp.where(in_band, 0.0, -1e30).astype(jnp.float32)       # (S, S)
    qmask_bias = jnp.where(mask == 0, -1e20, 0.0).astype(jnp.float32)     # (N, S)
    bias = (qmask_bias[:, :, None] + band_bias[None, :, :]) * INV_SCALE   # (N, S, S)
    bias_rows = jnp.tile(bias.reshape(1, N * S, S),
                         (HEADS, 1, 1)).reshape(HEADS * N * S, S)

    # one packed, full-128-lane activation tile (layout glue only, XLA side):
    #   cols [v | k | q | bias | original query (rows 0:N*S) | zero pad]
    x = jnp.zeros((HEADS * N * S, X_LANES), jnp.float32)
    x = x.at[:, _C_V:_C_V + HEAD_DIM].set(head_major_rows(value))
    x = x.at[:, _C_K:_C_K + HEAD_DIM].set(head_major_rows(key))
    x = x.at[:, _C_Q:_C_Q + HEAD_DIM].set(head_major_rows(query))
    x = x.at[:, _C_BIAS:_C_BIAS + S].set(bias_rows)
    x = x.at[0:N * S, _C_QIN:_C_QIN + E].set(query.reshape(N * S, E))

    # gridless single invocation: whole arrays in VMEM, 2 input + 1 output DMA
    out2d = pl.pallas_call(
        transformer_block_kernel,
        out_shape=jax.ShapeDtypeStruct((N * S, E), jnp.float32),
    )(x, packed_params)
    return out2d.reshape(N, S, E)


def pack_params(wv, wk, wq, wfc, bfc, g1, b1, w1, bb1, w2, bb2, g2, b2):
    """Pack all 13 parameter tensors into one (264, 64) f32 array (host-side glue)."""
    D = HEAD_DIM
    P = jnp.zeros((_P_ROWS, _P_COLS), jnp.float32)
    # x @ W.T == x @ W_t  -- weights stored pre-transposed.
    # Projection weight spans rows 0:128 (matching x's 128 lanes); rows facing
    # the bias/query/pad lanes stay zero.  Wq is pre-scaled by 1/sqrt(embed).
    P = P.at[_R_PROJ + _C_V:_R_PROJ + _C_V + D, _C_V:_C_V + D].set(wv.T)
    P = P.at[_R_PROJ + _C_K:_R_PROJ + _C_K + D, _C_K:_C_K + D].set(wk.T)
    P = P.at[_R_PROJ + _C_Q:_R_PROJ + _C_Q + D, _C_Q:_C_Q + D].set(wq.T * INV_SCALE)
    P = P.at[_R_FC:_R_FC + EMBED, 0:EMBED].set(wfc.T)
    P = P.at[_R_W1:_R_W1 + EMBED, 0:HIDDEN].set(w1.T)
    P = P.at[_R_W2:_R_W2 + HIDDEN, 0:EMBED].set(w2.T)
    P = P.at[_R_VEC + 0, 0:EMBED].set(bfc)
    P = P.at[_R_VEC + 1, 0:EMBED].set(g1)
    P = P.at[_R_VEC + 2, 0:EMBED].set(b1)
    P = P.at[_R_VEC + 3, 0:HIDDEN].set(bb1)
    P = P.at[_R_VEC + 4, 0:EMBED].set(bb2)
    P = P.at[_R_VEC + 5, 0:EMBED].set(g2)
    P = P.at[_R_VEC + 6, 0:EMBED].set(b2)
    return P


if __name__ == "__main__":
    root = jax.random.PRNGKey(0)
    ks = jax.random.split(root, 16)

    def uni(k, shape, fan_in):
        bound = 1.0 / (fan_in ** 0.5)
        return jax.random.uniform(k, shape, jnp.float32, -bound, bound)

    # parameters (deterministic init, PyTorch-like uniform fan-in scaling)
    wv = uni(ks[0], (HEAD_DIM, HEAD_DIM), HEAD_DIM)     # nn.Linear(D, D), no bias
    wk = uni(ks[1], (HEAD_DIM, HEAD_DIM), HEAD_DIM)
    wq = uni(ks[2], (HEAD_DIM, HEAD_DIM), HEAD_DIM)
    wfc = uni(ks[3], (EMBED, EMBED), EMBED)             # nn.Linear(E, E)
    bfc = uni(ks[4], (EMBED,), EMBED)
    g1 = jnp.ones((EMBED,), jnp.float32)                # nn.LayerNorm(E)
    b1 = jnp.zeros((EMBED,), jnp.float32)
    w1 = uni(ks[5], (HIDDEN, EMBED), EMBED)             # nn.Linear(E, F*E)
    bb1 = uni(ks[6], (HIDDEN,), EMBED)
    w2 = uni(ks[7], (EMBED, HIDDEN), HIDDEN)            # nn.Linear(F*E, E)
    bb2 = uni(ks[8], (EMBED,), HIDDEN)
    g2 = jnp.ones((EMBED,), jnp.float32)
    b2 = jnp.zeros((EMBED,), jnp.float32)

    packed = pack_params(wv, wk, wq, wfc, bfc, g1, b1, w1, bb1, w2, bb2, g2, b2)

    # inputs
    value = jax.random.normal(ks[9], (BATCH, SEQ, EMBED), jnp.float32)
    key_x = jax.random.normal(ks[10], (BATCH, SEQ, EMBED), jnp.float32)
    query = jax.random.normal(ks[11], (BATCH, SEQ, EMBED), jnp.float32)
    mask = (jax.random.uniform(ks[12], (BATCH, SEQ)) > 0.2).astype(jnp.float32)

    out = transformer_block(value, key_x, query, mask, packed)
    jax.block_until_ready(out)
    assert out.shape == (BATCH, SEQ, EMBED)
    print("KERNEL_OK")
</pallas_src>

<mosaic_0001>
module attributes {stable_mosaic.version = 11 : i64} {
  func.func @transformer_block_kernel(%arg0: memref<64x128xf32, #tpu.memory_space<vmem>>, %arg1: memref<264x64xf32, #tpu.memory_space<vmem>>, %arg2: memref<16x32xf32, #tpu.memory_space<vmem>>) attributes {dimension_semantics = [], scalar_prefetch = 0 : i64, scratch_operands = 0 : i64, tpu.core_type = #tpu.core_type<tc>} {
    %c0 = arith.constant 0 : index
    %c0_0 = arith.constant 0 : index
    %0 = vector.load %arg0[%c0, %c0_0] : memref<64x128xf32, #tpu.memory_space<vmem>>, vector<64x128xf32>
    %c0_1 = arith.constant 0 : index
    %c0_2 = arith.constant 0 : index
    %1 = vector.load %arg1[%c0_1, %c0_2] : memref<264x64xf32, #tpu.memory_space<vmem>>, vector<128x24xf32>
    %cst = arith.constant dense<0.000000e+00> : vector<64x24xf32>
    %2 = tpu.matmul %0, %1, %cst {dimension_numbers = #tpu.dot_dimension_numbers<[1], [0], [0], [1], [0, 0, 1, 1], [], []>} : vector<64x128xf32>, vector<128x24xf32>, vector<64x24xf32> -> vector<64x24xf32>
    %3 = vector.extract_strided_slice %2 {offsets = [0, 0], sizes = [64, 8], strides = [1, 1]} : vector<64x24xf32> to vector<64x8xf32>
    %4 = vector.shape_cast %3 : vector<64x8xf32> to vector<8x8x8xf32>
    %5 = vector.extract_strided_slice %2 {offsets = [0, 8], sizes = [64, 8], strides = [1, 1]} : vector<64x24xf32> to vector<64x8xf32>
    %6 = vector.shape_cast %5 : vector<64x8xf32> to vector<8x8x8xf32>
    %7 = vector.extract_strided_slice %2 {offsets = [0, 16], sizes = [64, 8], strides = [1, 1]} : vector<64x24xf32> to vector<64x8xf32>
    %8 = vector.shape_cast %7 : vector<64x8xf32> to vector<8x8x8xf32>
    %9 = vector.extract_strided_slice %0 {offsets = [0, 24], sizes = [64, 8], strides = [1, 1]} : vector<64x128xf32> to vector<64x8xf32>
    %10 = vector.shape_cast %9 : vector<64x8xf32> to vector<8x8x8xf32>
    "tpu.trace_start"() <{level = 10 : i32, message = "bqd,bkd->bqk"}> : () -> ()
    %cst_3 = arith.constant dense<0.000000e+00> : vector<8x8x8xf32>
    %11 = tpu.matmul %8, %6, %cst_3 {dimension_numbers = #tpu.dot_dimension_numbers<[2], [2], [1], [1], [0, 0, 0, 1, 1, 1], [0], [0]>} : vector<8x8x8xf32>, vector<8x8x8xf32>, vector<8x8x8xf32> -> vector<8x8x8xf32>
    "tpu.trace_stop"() : () -> ()
    %12 = arith.addf %11, %10 : vector<8x8x8xf32>
    %cst_4 = arith.constant dense<0xFF800000> : vector<8x8xf32>
    %13 = vector.multi_reduction <maximumf>, %12, %cst_4 [2] : vector<8x8x8xf32> to vector<8x8xf32>
    %14 = vector.shape_cast %13 : vector<8x8xf32> to vector<8x8x1xf32>
    %15 = vector.broadcast %14 : vector<8x8x1xf32> to vector<8x8x8xf32>
    %16 = arith.subf %12, %15 : vector<8x8x8xf32>
    %17 = math.exp %16 : vector<8x8x8xf32>
    %cst_5 = arith.constant dense<0.000000e+00> : vector<8x8xf32>
    %18 = vector.multi_reduction <add>, %17, %cst_5 [2] : vector<8x8x8xf32> to vector<8x8xf32>
    %19 = vector.shape_cast %18 : vector<8x8xf32> to vector<8x8x1xf32>
    %20 = tpu.reciprocal %19 {approx = true} : vector<8x8x1xf32> -> vector<8x8x1xf32>
    %21 = vector.broadcast %20 : vector<8x8x1xf32> to vector<8x8x8xf32>
    %22 = arith.mulf %17, %21 : vector<8x8x8xf32>
    "tpu.trace_start"() <{level = 10 : i32, message = "bqk,bkd->bqd"}> : () -> ()
    %cst_6 = arith.constant dense<0.000000e+00> : vector<8x8x8xf32>
    %23 = tpu.matmul %22, %4, %cst_6 {dimension_numbers = #tpu.dot_dimension_numbers<[2], [1], [1], [2], [0, 0, 0, 1, 1, 2], [0], [0]>} : vector<8x8x8xf32>, vector<8x8x8xf32>, vector<8x8x8xf32> -> vector<8x8x8xf32>
    "tpu.trace_stop"() : () -> ()
    %24 = vector.shape_cast %23 : vector<8x8x8xf32> to vector<64x8xf32>
    %c128 = arith.constant 128 : index
    %c0_7 = arith.constant 0 : index
    %25 = vector.load %arg1[%c128, %c0_7] : memref<264x64xf32, #tpu.memory_space<vmem>>, vector<32x32xf32>
    %c256 = arith.constant 256 : index
    %c0_8 = arith.constant 0 : index
    %26 = vector.load %arg1[%c256, %c0_8] : memref<264x64xf32, #tpu.memory_space<vmem>>, vector<8x64xf32>
    %27 = vector.extract_strided_slice %26 {offsets = [0, 0], sizes = [1, 32], strides = [1, 1]} : vector<8x64xf32> to vector<1x32xf32>
    %28 = vector.extract_strided_slice %26 {offsets = [1, 0], sizes = [1, 32], strides = [1, 1]} : vector<8x64xf32> to vector<1x32xf32>
    %29 = vector.extract_strided_slice %26 {offsets = [2, 0], sizes = [1, 32], strides = [1, 1]} : vector<8x64xf32> to vector<1x32xf32>
    %30 = vector.extract_strided_slice %26 {offsets = [3, 0], sizes = [1, 64], strides = [1, 1]} : vector<8x64xf32> to vector<1x64xf32>
    %31 = vector.extract_strided_slice %26 {offsets = [4, 0], sizes = [1, 32], strides = [1, 1]} : vector<8x64xf32> to vector<1x32xf32>
    %32 = vector.extract_strided_slice %26 {offsets = [5, 0], sizes = [1, 32], strides = [1, 1]} : vector<8x64xf32> to vector<1x32xf32>
    %33 = vector.extract_strided_slice %26 {offsets = [6, 0], sizes = [1, 32], strides = [1, 1]} : vector<8x64xf32> to vector<1x32xf32>
    %34 = vector.extract_strided_slice %24 {offsets = [0, 0], sizes = [16, 8], strides = [1, 1]} : vector<64x8xf32> to vector<16x8xf32>
    %35 = vector.extract_strided_slice %25 {offsets = [0, 0], sizes = [8, 32], strides = [1, 1]} : vector<32x32xf32> to vector<8x32xf32>
    %cst_9 = arith.constant dense<0.000000e+00> : vector<16x32xf32>
    %36 = tpu.matmul %34, %35, %cst_9 {dimension_numbers = #tpu.dot_dimension_numbers<[1], [0], [0], [1], [0, 0, 1, 1], [], []>} : vector<16x8xf32>, vector<8x32xf32>, vector<16x32xf32> -> vector<16x32xf32>
    %37 = vector.extract_strided_slice %24 {offsets = [16, 0], sizes = [16, 8], strides = [1, 1]} : vector<64x8xf32> to vector<16x8xf32>
    %38 = vector.extract_strided_slice %25 {offsets = [8, 0], sizes = [8, 32], strides = [1, 1]} : vector<32x32xf32> to vector<8x32xf32>
    %cst_10 = arith.constant dense<0.000000e+00> : vector<16x32xf32>
    %39 = tpu.matmul %37, %38, %cst_10 {dimension_numbers = #tpu.dot_dimension_numbers<[1], [0], [0], [1], [0, 0, 1, 1], [], []>} : vector<16x8xf32>, vector<8x32xf32>, vector<16x32xf32> -> vector<16x32xf32>
    %40 = vector.extract_strided_slice %24 {offsets = [32, 0], sizes = [16, 8], strides = [1, 1]} : vector<64x8xf32> to vector<16x8xf32>
    %41 = vector.extract_strided_slice %25 {offsets = [16, 0], sizes = [8, 32], strides = [1, 1]} : vector<32x32xf32> to vector<8x32xf32>
    %cst_11 = arith.constant dense<0.000000e+00> : vector<16x32xf32>
    %42 = tpu.matmul %40, %41, %cst_11 {dimension_numbers = #tpu.dot_dimension_numbers<[1], [0], [0], [1], [0, 0, 1, 1], [], []>} : vector<16x8xf32>, vector<8x32xf32>, vector<16x32xf32> -> vector<16x32xf32>
    %43 = vector.extract_strided_slice %24 {offsets = [48, 0], sizes = [16, 8], strides = [1, 1]} : vector<64x8xf32> to vector<16x8xf32>
    %44 = vector.extract_strided_slice %25 {offsets = [24, 0], sizes = [8, 32], strides = [1, 1]} : vector<32x32xf32> to vector<8x32xf32>
    %cst_12 = arith.constant dense<0.000000e+00> : vector<16x32xf32>
    %45 = tpu.matmul %43, %44, %cst_12 {dimension_numbers = #tpu.dot_dimension_numbers<[1], [0], [0], [1], [0, 0, 1, 1], [], []>} : vector<16x8xf32>, vector<8x32xf32>, vector<16x32xf32> -> vector<16x32xf32>
    %46 = arith.addf %36, %39 : vector<16x32xf32>
    %47 = arith.addf %42, %45 : vector<16x32xf32>
    %48 = arith.addf %46, %47 : vector<16x32xf32>
    %49 = vector.broadcast %27 : vector<1x32xf32> to vector<16x32xf32>
    %50 = arith.addf %48, %49 : vector<16x32xf32>
    %51 = vector.extract_strided_slice %0 {offsets = [0, 32], sizes = [16, 32], strides = [1, 1]} : vector<64x128xf32> to vector<16x32xf32>
    %52 = arith.addf %50, %51 : vector<16x32xf32>
    %cst_13 = arith.constant dense<0.000000e+00> : vector<16xf32>
    %53 = vector.multi_reduction <add>, %52, %cst_13 [1] : vector<16x32xf32> to vector<16xf32>
    %54 = vector.shape_cast %53 : vector<16xf32> to vector<16x1xf32>
    %cst_14 = arith.constant 3.200000e+01 : f32
    %55 = vector.broadcast %cst_14 : f32 to vector<16x1xf32>
    %56 = arith.divf %54, %55 : vector<16x1xf32>
    %57 = arith.mulf %52, %52 : vector<16x32xf32>
    %cst_15 = arith.constant dense<0.000000e+00> : vector<16xf32>
    %58 = vector.multi_reduction <add>, %57, %cst_15 [1] : vector<16x32xf32> to vector<16xf32>
    %59 = vector.shape_cast %58 : vector<16xf32> to vector<16x1xf32>
    %cst_16 = arith.constant 3.200000e+01 : f32
    %60 = vector.broadcast %cst_16 : f32 to vector<16x1xf32>
    %61 = arith.divf %59, %60 : vector<16x1xf32>
    %62 = arith.mulf %56, %56 : vector<16x1xf32>
    %63 = arith.subf %61, %62 : vector<16x1xf32>
    %64 = vector.broadcast %56 : vector<16x1xf32> to vector<16x32xf32>
    %65 = arith.subf %52, %64 : vector<16x32xf32>
    %cst_17 = arith.constant 9.99999974E-6 : f32
    %66 = vector.broadcast %cst_17 : f32 to vector<16x1xf32>
    %67 = arith.addf %63, %66 : vector<16x1xf32>
    %68 = math.rsqrt %67 : vector<16x1xf32>
    %69 = vector.broadcast %68 : vector<16x1xf32> to vector<16x32xf32>
    %70 = arith.mulf %65, %69 : vector<16x32xf32>
    %71 = vector.broadcast %28 : vector<1x32xf32> to vector<16x32xf32>
    %72 = arith.mulf %70, %71 : vector<16x32xf32>
    %73 = vector.broadcast %29 : vector<1x32xf32> to vector<16x32xf32>
    %74 = arith.addf %72, %73 : vector<16x32xf32>
    %c160 = arith.constant 160 : index
    %c0_18 = arith.constant 0 : index
    %75 = vector.load %arg1[%c160, %c0_18] : memref<264x64xf32, #tpu.memory_space<vmem>>, vector<32x64xf32>
    %cst_19 = arith.constant dense<0.000000e+00> : vector<16x64xf32>
    %76 = tpu.matmul %74, %75, %cst_19 {dimension_numbers = #tpu.dot_dimension_numbers<[1], [0], [0], [1], [0, 0, 1, 1], [], []>} : vector<16x32xf32>, vector<32x64xf32>, vector<16x64xf32> -> vector<16x64xf32>
    %77 = vector.broadcast %30 : vector<1x64xf32> to vector<16x64xf32>
    %78 = arith.addf %76, %77 : vector<16x64xf32>
    %cst_20 = arith.constant 0.000000e+00 : f32
    %79 = vector.broadcast %cst_20 : f32 to vector<16x64xf32>
    %80 = arith.maximumf %78, %79 : vector<16x64xf32>
    %c192 = arith.constant 192 : index
    %c0_21 = arith.constant 0 : index
    %81 = vector.load %arg1[%c192, %c0_21] : memref<264x64xf32, #tpu.memory_space<vmem>>, vector<64x32xf32>
    %cst_22 = arith.constant dense<0.000000e+00> : vector<16x32xf32>
    %82 = tpu.matmul %80, %81, %cst_22 {dimension_numbers = #tpu.dot_dimension_numbers<[1], [0], [0], [1], [0, 0, 1, 1], [], []>} : vector<16x64xf32>, vector<64x32xf32>, vector<16x32xf32> -> vector<16x32xf32>
    %83 = vector.broadcast %31 : vector<1x32xf32> to vector<16x32xf32>
    %84 = arith.addf %82, %83 : vector<16x32xf32>
    %85 = arith.addf %84, %74 : vector<16x32xf32>
    %cst_23 = arith.constant dense<0.000000e+00> : vector<16xf32>
    %86 = vector.multi_reduction <add>, %85, %cst_23 [1] : vector<16x32xf32> to vector<16xf32>
    %87 = vector.shape_cast %86 : vector<16xf32> to vector<16x1xf32>
    %cst_24 = arith.constant 3.200000e+01 : f32
    %88 = vector.broadcast %cst_24 : f32 to vector<16x1xf32>
    %89 = arith.divf %87, %88 : vector<16x1xf32>
    %90 = arith.mulf %85, %85 : vector<16x32xf32>
    %cst_25 = arith.constant dense<0.000000e+00> : vector<16xf32>
    %91 = vector.multi_reduction <add>, %90, %cst_25 [1] : vector<16x32xf32> to vector<16xf32>
    %92 = vector.shape_cast %91 : vector<16xf32> to vector<16x1xf32>
    %cst_26 = arith.constant 3.200000e+01 : f32
    %93 = vector.broadcast %cst_26 : f32 to vector<16x1xf32>
    %94 = arith.divf %92, %93 : vector<16x1xf32>
    %95 = arith.mulf %89, %89 : vector<16x1xf32>
    %96 = arith.subf %94, %95 : vector<16x1xf32>
    %97 = vector.broadcast %89 : vector<16x1xf32> to vector<16x32xf32>
    %98 = arith.subf %85, %97 : vector<16x32xf32>
    %cst_27 = arith.constant 9.99999974E-6 : f32
    %99 = vector.broadcast %cst_27 : f32 to vector<16x1xf32>
    %100 = arith.addf %96, %99 : vector<16x1xf32>
    %101 = math.rsqrt %100 : vector<16x1xf32>
    %102 = vector.broadcast %101 : vector<16x1xf32> to vector<16x32xf32>
    %103 = arith.mulf %98, %102 : vector<16x32xf32>
    %104 = vector.broadcast %32 : vector<1x32xf32> to vector<16x32xf32>
    %105 = arith.mulf %103, %104 : vector<16x32xf32>
    %106 = vector.broadcast %33 : vector<1x32xf32> to vector<16x32xf32>
    %107 = arith.addf %105, %106 : vector<16x32xf32>
    %c0_28 = arith.constant 0 : index
    %c0_29 = arith.constant 0 : index
    %108 = vector.load %arg2[%c0_28, %c0_29] : memref<16x32xf32, #tpu.memory_space<vmem>>, vector<16x32xf32>
    tpu.vector_store %arg2[%c0_28, %c0_29], %107 {strides = array<i32>} : memref<16x32xf32, #tpu.memory_space<vmem>>, vector<16x32xf32>,
    return
  }
}

</mosaic_0001>

<bundles_post_ra>
// kernel: tpu_custom_call.1
= control target key start
LH: loop header
LB: loop body
LE: loop exit
PB: predicated region body
PF: predicated region fallthrough
CT: control target
= control target key end

     0   :  { %s2800_s0 = inlined_call_operand.vmem [shape: f32[64,128], index: 0, kind: input, shape index: {}]   ;;  %s2801_s1 = inlined_call_operand.vmem [shape: f32[264,64], index: 1, kind: input, shape index: {}]   ;;  %s2802_s2 = inlined_call_operand.hbm [shape: f32[16,32], index: 2, kind: output, shape index: {}]  }
   0x1   :  { %v35_v0 = vld [vmem:[%s2801_s1 + $0x78] sm:$0xff]  ;;  %v34_v1 = vld [vmem:[%s2801_s1 + $0x70] sm:$0xff]  ;;  %v33_v2 = vld [vmem:[%s2801_s1 + $0x68] sm:$0xff] }
   0x2   :  { %2234 = vmatprep.subr.mxu0 %v35_v0  ;;  %v32_v3 = vld [vmem:[%s2801_s1 + $0x60] sm:$0xff]  ;;  %v31_v5 = vld [vmem:[%s2801_s1 + $0x58] sm:$0xff]  ;;  %v30_v6 = vld [vmem:[%s2801_s1 + $0x50] sm:$0xff] }
   0x3   :  { %2235 = vmatpush3.msra.mxu0 %v35_v0  ;;  %v2518_v4 = vld [vmem:[%s2800_s0] sm:$0xff] }
   0x4   :  { %2236 = vmatprep.subr.mxu0 %v34_v1  ;;  %2266 = vmatprep.mubr.f32.mxu0 %v2518_v4 }
   0x5   :  { %2237 = vmatpush3.msra.mxu0 %v34_v1 }
   0x6   :  { %2238 = vmatprep.subr.mxu0 %v33_v2 }
   0x7   :  { %2239 = vmatpush3.msra.mxu0 %v33_v2 }
   0x8   :  { %2240 = vmatprep.subr.mxu0 %v32_v3 }
   0x9   :  { %2241 = vmatpush3.msra.mxu0 %v32_v3 }
   0xa   :  { %7 = vsyncpa [#allocation3], 0  ;;  %2242 = vmatprep.subr.mxu0 %v31_v5  ;;  %v29_v7 = vld [vmem:[%s2801_s1 + $0x48] sm:$0xff]  ;;  %v28_v8 = vld [vmem:[%s2801_s1 + $0x40] sm:$0xff]  ;;  %v2479_v24 = vmov 0.0   ;;  %vm2480_vm0 = vmmov 0  }
   0xb   :  { %2243 = vmatpush3.msra.mxu0 %v31_v5  ;;  %v27_v9 = vld [vmem:[%s2801_s1 + $0x38] sm:$0xff]  ;;  %v26_v10 = vld [vmem:[%s2801_s1 + $0x30] sm:$0xff]  ;;  %v25_v11 = vld [vmem:[%s2801_s1 + $0x28] sm:$0xff]  ;;  %2278 = vmatprep.subr.mxu1 %v2479_v24  ;;  %s2481_s29 = smov 120   ;;  %s2483_s30 = smov 104   ;;  %vm150_vm1 = vcmask 64512  }
   0xc   :  { %2244 = vmatprep.subr.mxu0 %v30_v6  ;;  %v24_v12 = vld [vmem:[%s2801_s1 + $0x20] sm:$0xff]  ;;  %v23_v13 = vld [vmem:[%s2801_s1 + $0x18] sm:$0xff]  ;;  %v22_v14 = vld [vmem:[%s2801_s1 + $0x10] sm:$0xff]  ;;  %2280 = vmatprep.mubr.msk.f32.mxu1 %vm2480_vm0, %v2479_v24  ;;  %s2484_s11 = smov 96   ;;  %vm1823_vm2 = vcmask 261120   ;;  %vm1970_vm3 = vcmask 523264  }
   0xd   :  { %2245 = vmatpush3.msra.mxu0 %v30_v6  ;;  %v21_v15 = vld [vmem:[%s2801_s1 + $0x8] sm:$0xff]  ;;  %v20_v16 = vld [vmem:[%s2801_s1] sm:$0xff]  ;;  %v14_v18 = vld [vmem:[%s2800_s0 + $0x10] sm:$0xff] }
   0xe   :  { %2246 = vmatprep.subr.mxu0 %v29_v7  ;;  %v2560_v17 = vld [vmem:[%s2800_s0 + $0x8] sm:$0xff]  ;;  %v15_v19 = vld [vmem:[%s2800_s0 + $0x18] sm:$0xff]  ;;  %v16_v20 = vld [vmem:[%s2800_s0 + $0x20] sm:$0xff] }
   0xf   :  { %2247 = vmatpush3.msra.mxu0 %v29_v7  ;;  %v17_v21 = vld [vmem:[%s2800_s0 + $0x28] sm:$0xff]  ;;  %v18_v22 = vld [vmem:[%s2800_s0 + $0x30] sm:$0xff]  ;;  %v19_v23 = vld [vmem:[%s2800_s0 + $0x38] sm:$0xff]  ;;  %s2482_s0 = smov 112  }
  0x10   :  { %2248 = vmatprep.subr.mxu0 %v28_v8 }
  0x11   :  { %2249 = vmatpush3.msra.mxu0 %v28_v8 }
  0x12   :  { %2250 = vmatprep.subr.mxu0 %v27_v9 }
  0x13   :  { %2251 = vmatpush3.msra.mxu0 %v27_v9 }
  0x14   :  { %2252 = vmatprep.subr.mxu0 %v26_v10 }
  0x15   :  { %2253 = vmatpush3.msra.mxu0 %v26_v10 }
  0x16   :  { %2254 = vmatprep.subr.mxu0 %v25_v11 }
  0x17   :  { %2255 = vmatpush3.msra.mxu0 %v25_v11 }
  0x18   :  { %2256 = vmatprep.subr.mxu0 %v24_v12 }
  0x19   :  { %2257 = vmatpush3.msra.mxu0 %v24_v12 }
  0x1a   :  { %2258 = vmatprep.subr.mxu0 %v23_v13 }
  0x1b   :  { %2259 = vmatpush3.msra.mxu0 %v23_v13 }
  0x1c   :  { %2260 = vmatprep.subr.mxu0 %v22_v14 }
  0x1d   :  { %2261 = vmatpush3.msra.mxu0 %v22_v14 }
  0x1e   :  { %2262 = vmatprep.subr.mxu0 %v21_v15 }
  0x1f   :  { %2263 = vmatpush3.msra.mxu0 %v21_v15 }
  0x20   :  { %2264 = vmatprep.subr.mxu0 %v20_v16 }
  0x21   :  { %2265 = vmatpush3.msra.mxu0 %v20_v16 }
  0x22   :  { %2267 = vmatmul.mubr.f32.vlgmr.msra.gmra.mxu0 %v2560_v17  ;;  %2343 = vmatprep.subr.mxu0 %v2479_v24 }
  0x23   :  { %2269 = vmatprep.mubr.f32.mxu0 %v14_v18 }
  0x26   :  { %2270 = vmatmul.mubr.f32.gmra.mxu0 %v15_v19 }
  0x27   :  { %2272 = vmatprep.mubr.f32.mxu0 %v16_v20 }
  0x2a   :  { %2273 = vmatmul.mubr.f32.gmra.mxu0 %v17_v21 }
  0x2b   :  { %2275 = vmatprep.mubr.f32.mxu0 %v18_v22 }
  0x2e   :  { %2276 = vmatmul.mubr.f32.gmra.mxu0 %v19_v23 }
  0x2f   :  { %2345 = vmatprep.mubr.msk.f32.mxu0 %vm2480_vm0, %v2479_v24 }
  0xe2   :  { %v2587_v25 = vpop.f32.mrf.mxu0 }
  0xe3   :  { %228 = vrot.lane.b32.xlu1 %v2587_v25, %s2481_s29 }
  0xe4   :  { %v2590_v26 = vpop.f32.mrf.mxu0 }
  0xe5   :  { %144 = vrot.lane.b32.xlu0 %v2590_v26, %s2481_s29 }
  0xe6   :  { %v2593_v27 = vpop.f32.mrf.mxu0 }
  0xe7   :  { %226 = vrot.lane.b32.xlu1 %v2587_v25, %s2482_s0 }
  0xe8   :  { %v2596_v28 = vpop.f32.mrf.mxu0 }
  0xe9   :  { %142 = vrot.lane.b32.xlu0 %v2590_v26, %s2482_s0 }
  0xea   :  { %v2274_v29 = vpop.f32.mrf.mxu0 }
  0xeb   :  { %309 = vrot.lane.b32.xlu1 %v2596_v28, %s2482_s0  ;;  %2344 = vmatpush3.msra.mxu0 %v2274_v29 }
  0xec   :  { %2353 = vmatprep.subr.mxu0 %v2479_v24  ;;  %v2603_v30 = vpop.f32.mrf.mxu0 }
  0xed   :  { %311 = vrot.lane.b32.xlu0 %v2596_v28, %s2481_s29 }
  0xee   :  { %v2607_v31 = vpop.f32.mrf.mxu0 }
  0xef   :  { %392 = vrot.lane.b32.xlu1 %v2593_v27, %s2482_s0 }
  0xf0   :  { %v2610_v32 = vpop.f32.mrf.mxu0 }
  0xf1   :  { %394 = vrot.lane.b32.xlu0 %v2593_v27, %s2481_s29 }
  0xf3   :  { %475 = vrot.lane.b32.xlu1 %v2603_v30, %s2482_s0 }
  0xf5   :  { %477 = vrot.lane.b32.xlu0 %v2603_v30, %s2481_s29 }
  0xf7   :  { %558 = vrot.lane.b32.xlu1 %v2274_v29, %s2482_s0 }
  0xf9   :  { %560 = vrot.lane.b32.xlu0 %v2274_v29, %s2481_s29 }
  0xfb   :  { %641 = vrot.lane.b32.xlu1 %v2610_v32, %s2482_s0 }
  0xfd   :  { %643 = vrot.lane.b32.xlu0 %v2610_v32, %s2481_s29 }
  0xff   :  { %724 = vrot.lane.b32.xlu1 %v2607_v31, %s2482_s0 }
 0x101   :  { %726 = vrot.lane.b32.xlu0 %v2607_v31, %s2481_s29 }
 0x103   :  { %231 = vrot.lane.b32.xlu1 %v2560_v17, %s2483_s30 }
 0x105   :  { %147 = vrot.lane.b32.xlu0 %v2518_v4, %s2483_s30 }
 0x107   :  { %397 = vrot.lane.b32.xlu1 %v15_v19, %s2483_s30 }
 0x109   :  { %314 = vrot.lane.b32.xlu0 %v14_v18, %s2483_s30 }
 0x10b   :  { %563 = vrot.lane.b32.xlu1 %v17_v21, %s2483_s30 }
 0x10d   :  { %480 = vrot.lane.b32.xlu0 %v16_v20, %s2483_s30 }
 0x10f   :  { %729 = vrot.lane.b32.xlu1 %v19_v23, %s2483_s30 }
 0x111   :  { %646 = vrot.lane.b32.xlu0 %v18_v22, %s2483_s30 }
 0x155   :  { %v229_v33 = vpop.permute.xlu1 %228 }
 0x157   :  { %v145_v34 = vpop.permute.xlu0 %144 }
 0x158   :  { %2279 = vmatpush3.xpose.msk.msra.mxu1 %vm150_vm1, %v145_v34 }
 0x159   :  { %v227_v35 = vpop.permute.xlu1 %226  ;;  %2283 = vmatprep.subr.mxu1 %v2479_v24 }
 0x15b   :  { %v143_v36 = vpop.permute.xlu0 %142 }
 0x15c   :  { %2281 = vmatmul.mubr.msk.f32.vlgmr.msra.gmra.mxu1 %vm150_vm1, %v143_v36 }
 0x15d   :  { %2284 = vmatpush3.xpose.msk.msra.mxu1 %vm150_vm1, %v229_v33  ;;  %v310_v37 = vpop.permute.xlu1 %309  ;;  %2285 = vmatprep.mubr.msk.f32.mxu1 %vm2480_vm0, %v2479_v24 }
 0x15e   :  { %2288 = vmatprep.subr.mxu1 %v2479_v24 }
 0x15f   :  { %v312_v38 = vpop.permute.xlu0 %311 }
 0x160   :  { %2286 = vmatmul.mubr.msk.f32.vlgmr.msra.gmra.mxu1 %vm150_vm1, %v227_v35 }
 0x161   :  { %2289 = vmatpush3.xpose.msk.msra.mxu1 %vm150_vm1, %v312_v38  ;;  %v393_v39 = vpop.permute.xlu1 %392  ;;  %2290 = vmatprep.mubr.msk.f32.mxu1 %vm2480_vm0, %v2479_v24 }
 0x162   :  { %2293 = vmatprep.subr.mxu1 %v2479_v24 }
 0x163   :  { %v395_v40 = vpop.permute.xlu0 %394 }
 0x164   :  { %2291 = vmatmul.mubr.msk.f32.vlgmr.msra.gmra.mxu1 %vm150_vm1, %v310_v37 }
 0x165   :  { %2294 = vmatpush3.xpose.msk.msra.mxu1 %vm150_vm1, %v395_v40  ;;  %v476_v41 = vpop.permute.xlu1 %475  ;;  %2295 = vmatprep.mubr.msk.f32.mxu1 %vm2480_vm0, %v2479_v24 }
 0x166   :  { %2298 = vmatprep.subr.mxu1 %v2479_v24 }
 0x167   :  { %v478_v42 = vpop.permute.xlu0 %477 }
 0x168   :  { %2296 = vmatmul.mubr.msk.f32.vlgmr.msra.gmra.mxu1 %vm150_vm1, %v393_v39 }
 0x169   :  { %2299 = vmatpush3.xpose.msk.msra.mxu1 %vm150_vm1, %v478_v42  ;;  %2300 = vmatprep.mubr.msk.f32.mxu1 %vm2480_vm0, %v2479_v24  ;;  %v559_v43 = vpop.permute.xlu1 %558 }
 0x16a   :  { %2303 = vmatprep.subr.mxu1 %v2479_v24 }
 0x16b   :  { %v561_v44 = vpop.permute.xlu0 %560 }
 0x16c   :  { %2301 = vmatmul.mubr.msk.f32.vlgmr.msra.gmra.mxu1 %vm150_vm1, %v476_v41 }
 0x16d   :  { %2304 = vmatpush3.xpose.msk.msra.mxu1 %vm150_vm1, %v561_v44  ;;  %2305 = vmatprep.mubr.msk.f32.mxu1 %vm2480_vm0, %v2479_v24  ;;  %v642_v46 = vpop.permute.xlu1 %641 }
 0x16e   :  { %2308 = vmatprep.subr.mxu1 %v2479_v24 }
 0x16f   :  { %v644_v45 = vpop.permute.xlu0 %643 }
 0x170   :  { %2306 = vmatmul.mubr.msk.f32.vlgmr.msra.gmra.mxu1 %vm150_vm1, %v559_v43 }
 0x171   :  { %2309 = vmatpush3.xpose.msk.msra.mxu1 %vm150_vm1, %v644_v45  ;;  %2310 = vmatprep.mubr.msk.f32.mxu1 %vm2480_vm0, %v2479_v24  ;;  %v725_v48 = vpop.permute.xlu1 %724 }
 0x172   :  { %2313 = vmatprep.subr.mxu1 %v2479_v24 }
 0x173   :  { %v727_v47 = vpop.permute.xlu0 %726 }
 0x174   :  { %2311 = vmatmul.mubr.msk.f32.vlgmr.msra.gmra.mxu1 %vm150_vm1, %v642_v46 }
 0x175   :  { %2314 = vmatpush3.xpose.msk.msra.mxu1 %vm150_vm1, %v727_v47  ;;  %2315 = vmatprep.mubr.msk.f32.mxu1 %vm2480_vm0, %v2479_v24  ;;  %v232_v53 = vpop.permute.xlu1 %231 }
 0x176   :  { %2318 = vmatprep.subr.mxu1 %v2479_v24 }
 0x177   :  { %v148_v49 = vpop.permute.xlu0 %147 }
 0x178   :  { %2316 = vmatmul.mubr.msk.f32.vlgmr.msra.gmra.mxu1 %vm150_vm1, %v725_v48 }
 0x179   :  { %2319 = vmatpush3.msra.mxu1 %v2590_v26  ;;  %2320 = vmatprep.mubr.msk.f32.mxu1 %vm2480_vm0, %v2479_v24  ;;  %v398_v63 = vpop.permute.xlu1 %397 }
 0x17a   :  { %2323 = vmatprep.subr.mxu1 %v2479_v24 }
 0x17b   :  { %v315_v58 = vpop.permute.xlu0 %314 }
 0x17d   :  { %v564_v10 = vpop.permute.xlu1 %563 }
 0x17f   :  { %v481_v5 = vpop.permute.xlu0 %480 }
 0x181   :  { %v730_v21 = vpop.permute.xlu1 %729 }
 0x183   :  { %v647_v15 = vpop.permute.xlu0 %646 }
 0x21c   :  { %v221_v50 = vpop.f32.mrf.mxu1 }
 0x21d   :  { %v222_v51 = vadd.f32 %v221_v50, %v148_v49 }
 0x21e   :  { %v2282_v52 = vpop.f32.mrf.mxu1 }
 0x21f   :  { %v806_v54 = vsel %vm150_vm1, %v222_v51, -inf }
 0x220   :  { %v304_v55 = vpop.f32.mrf.mxu1  ;;  %807 = vmax.xlane.f32.xlu0 %v806_v54 }
 0x221   :  { %v305_v56 = vadd.f32 %v304_v55, %v232_v53 }
 0x222   :  { %v2287_v57 = vpop.f32.mrf.mxu1 }
 0x223   :  { %v809_v59 = vsel %vm150_vm1, %v305_v56, -inf }
 0x224   :  { %v387_v60 = vpop.f32.mrf.mxu1  ;;  %810 = vmax.xlane.f32.xlu1 %v809_v59 }
 0x225   :  { %v388_v61 = vadd.f32 %v387_v60, %v315_v58 }
 0x226   :  { %v2292_v62 = vpop.f32.mrf.mxu1 }
 0x227   :  { %v812_v0 = vsel %vm150_vm1, %v388_v61, -inf }
 0x228   :  { %v470_v1 = vpop.f32.mrf.mxu1  ;;  %813 = vmax.xlane.f32.xlu0 %v812_v0 }
 0x229   :  { %v471_v2 = vadd.f32 %v470_v1, %v398_v63 }
 0x22a   :  { %v2297_v3 = vpop.f32.mrf.mxu1 }
 0x22b   :  { %v815_v6 = vsel %vm150_vm1, %v471_v2, -inf }
 0x22c   :  { %v553_v7 = vpop.f32.mrf.mxu1  ;;  %816 = vmax.xlane.f32.xlu0 %v815_v6 }
 0x22d   :  { %v554_v8 = vadd.f32 %v553_v7, %v481_v5 }
 0x22e   :  { %v2302_v9 = vpop.f32.mrf.mxu1 }
 0x22f   :  { %v818_v11 = vsel %vm150_vm1, %v554_v8, -inf }
 0x230   :  { %v636_v12 = vpop.f32.mrf.mxu1  ;;  %819 = vmax.xlane.f32.xlu1 %v818_v11 }
 0x231   :  { %v637_v13 = vadd.f32 %v636_v12, %v564_v10 }
 0x232   :  { %v2307_v14 = vpop.f32.mrf.mxu1 }
 0x233   :  { %v821_v16 = vsel %vm150_vm1, %v637_v13, -inf }
 0x234   :  { %v719_v18 = vpop.f32.mrf.mxu1  ;;  %822 = vmax.xlane.f32.xlu0 %v821_v16 }
 0x235   :  { %v720_v19 = vadd.f32 %v719_v18, %v647_v15 }
 0x236   :  { %v2312_v20 = vpop.f32.mrf.mxu1 }
 0x237   :  { %v824_v22 = vsel %vm150_vm1, %v720_v19, -inf }
 0x238   :  { %v802_v23 = vpop.f32.mrf.mxu1  ;;  %825 = vmax.xlane.f32.xlu1 %v824_v22 }
 0x239   :  { %v803_v26 = vadd.f32 %v802_v23, %v730_v21 }
 0x23a   :  { %v2317_v29 = vpop.f32.mrf.mxu1 }
 0x23b   :  { %v827_v33 = vsel %vm150_vm1, %v803_v26, -inf }
 0x23c   :  { %828 = vmax.xlane.f32.xlu0 %v827_v33 }
 0x2a9   :  { %v808_v34 = vpop.xlane.xlu0 %807 }
 0x2aa   :  { %v830_v35 = vsub.f32 %v222_v51, %v808_v34 }
 0x2ac   :  { %v838_v36 = vmul.f32 1.442695, %v830_v35 }
 0x2ad   :  { %v811_v37 = vpop.xlane.xlu1 %810 }
 0x2ae   :  { %2417 = vpow2.f32 %v838_v36  ;;  %v831_v38 = vsub.f32 %v305_v56, %v811_v37 }
 0x2b0   :  { %v840_v39 = vmul.f32 1.442695, %v831_v38 }
 0x2b1   :  { %v814_v40 = vpop.xlane.xlu0 %813 }
 0x2b2   :  { %2419 = vpow2.f32 %v840_v39  ;;  %v832_v41 = vsub.f32 %v388_v61, %v814_v40  ;;  %v1480_v39 = vld [vmem:[%s2801_s1 + $0x90] sm:$0xff] }
 0x2b4   :  { %v842_v42 = vmul.f32 1.442695, %v832_v41 }
 0x2b5   :  { %v817_v43 = vpop.xlane.xlu0 %816 }
 0x2b6   :  { %2421 = vpow2.f32 %v842_v42  ;;  %v833_v44 = vsub.f32 %v471_v2, %v817_v43 }
 0x2b8   :  { %v844_v45 = vmul.f32 1.442695, %v833_v44 }
 0x2b9   :  { %v820_v46 = vpop.xlane.xlu1 %819 }
 0x2ba   :  { %2423 = vpow2.f32 %v844_v45  ;;  %v834_v47 = vsub.f32 %v554_v8, %v820_v46 }
 0x2bb   :  { %v2418_v48 = vpop.eup %2417 }
 0x2bc   :  { %v846_v49 = vmul.f32 1.442695, %v834_v47  ;;  %v854_v50 = vsel %vm150_vm1, %v2418_v48, 0.0 }
 0x2bd   :  { %855 = vadd.xlane.f32.xlu1 %v854_v50  ;;  %v823_v51 = vpop.xlane.xlu0 %822 }
 0x2be   :  { %2425 = vpow2.f32 %v846_v49  ;;  %v835_v52 = vsub.f32 %v637_v13, %v823_v51 }
 0x2bf   :  { %v2420_v53 = vpop.eup %2419 }
 0x2c0   :  { %v848_v54 = vmul.f32 1.442695, %v835_v52  ;;  %v857_v55 = vsel %vm150_vm1, %v2420_v53, 0.0 }
 0x2c1   :  { %858 = vadd.xlane.f32.xlu0 %v857_v55  ;;  %v826_v56 = vpop.xlane.xlu1 %825  ;;  %v1809_v55 = vlaneseq }
 0x2c2   :  { %2427 = vpow2.f32 %v848_v54  ;;  %v836_v57 = vsub.f32 %v720_v19, %v826_v56 }
 0x2c3   :  { %v2422_v58 = vpop.eup %2421 }
 0x2c4   :  { %v850_v59 = vmul.f32 1.442695, %v836_v57  ;;  %v860_v60 = vsel %vm150_vm1, %v2422_v58, 0.0  ;;  %v2728_v57 = vshrl.u32 %v1809_v55, 7 }
 0x2c5   :  { %861 = vadd.xlane.f32.xlu1 %v860_v60  ;;  %v829_v61 = vpop.xlane.xlu0 %828 }
 0x2c6   :  { %2429 = vpow2.f32 %v850_v59  ;;  %v837_v62 = vsub.f32 %v803_v26, %v829_v61  ;;  %v1811_v60 = vsub.s32 0, %v2728_v57 }
 0x2c7   :  { %v2424_v63 = vpop.eup %2423 }
 0x2c8   :  { %v852_v0 = vmul.f32 1.442695, %v837_v62  ;;  %v863_v1 = vsel %vm150_vm1, %v2424_v63, 0.0  ;;  %v2734_v62 = vld [vmem:[%s2801_s1 + $0x100] sm:$0xff] }
 0x2c9   :  { %864 = vadd.xlane.f32.xlu0 %v863_v1 }
 0x2ca   :  { %2431 = vpow2.f32 %v852_v0 }
 0x2cb   :  { %v2426_v2 = vpop.eup %2425 }
 0x2cc   :  { %v866_v3 = vsel %vm150_vm1, %v2426_v2, 0.0 }
 0x2cd   :  { %867 = vadd.xlane.f32.xlu1 %v866_v3  ;;  %v1812_v3 = vrot.slane %v2734_v62, %v1811_v60  ;;  %v1959_v60 = vld [vmem:[%s2801_s1 + $0xc8] sm:$0xff] }
 0x2cf   :  { %v2428_v5 = vpop.eup %2427 }
 0x2d0   :  { %v869_v6 = vsel %vm150_vm1, %v2428_v5, 0.0 }
 0x2d1   :  { %870 = vadd.xlane.f32.xlu0 %v869_v6 }
 0x2d3   :  { %v2430_v7 = vpop.eup %2429 }
 0x2d4   :  { %v872_v8 = vsel %vm150_vm1, %v2430_v7, 0.0 }
 0x2d5   :  { %873 = vadd.xlane.f32.xlu1 %v872_v8 }
 0x2d7   :  { %v2432_v9 = vpop.eup %2431 }
 0x2d8   :  { %v875_v10 = vsel %vm150_vm1, %v2432_v9, 0.0 }
 0x2d9   :  { %876 = vadd.xlane.f32.xlu0 %v875_v10 }
 0x2e6   :  { %1815 = vrot.lane.b32.xlu1 %v2518_v4, %s2484_s11 }
 0x2ef   :  { %1817 = vrot.lane.b32.xlu0 %v2560_v17, %s2484_s11 }
 0x346   :  { %v856_v11 = vpop.xlane.xlu1 %855 }
 0x347   :  { %2433 = vrcp.f32 %v856_v11 }
 0x34a   :  { %v859_v12 = vpop.xlane.xlu0 %858 }
 0x34b   :  { %2435 = vrcp.f32 %v859_v12 }
 0x34e   :  { %v862_v13 = vpop.xlane.xlu1 %861 }
 0x34f   :  { %2437 = vrcp.f32 %v862_v13 }
 0x352   :  { %v865_v14 = vpop.xlane.xlu0 %864 }
 0x353   :  { %2439 = vrcp.f32 %v865_v14 }
 0x354   :  { %v2434_v15 = vpop.eup %2433 }
 0x355   :  { %v886_v16 = vmul.f32 %v2434_v15, %v2418_v48 }
 0x356   :  { %v868_v18 = vpop.xlane.xlu1 %867 }
 0x357   :  { %2441 = vrcp.f32 %v868_v18  ;;  %2321 = vmatmul.mubr.msk.f32.vlgmr.msra.gmra.mxu1 %vm150_vm1, %v886_v16 }
 0x358   :  { %v2436_v19 = vpop.eup %2435  ;;  %2324 = vmatpush3.msra.mxu1 %v2587_v25  ;;  %2325 = vmatprep.mubr.msk.f32.mxu1 %vm2480_vm0, %v2479_v24 }
 0x359   :  { %2328 = vmatprep.subr.mxu1 %v2479_v24  ;;  %v887_v20 = vmul.f32 %v2436_v19, %v2420_v53 }
 0x35a   :  { %v871_v21 = vpop.xlane.xlu0 %870 }
 0x35b   :  { %2443 = vrcp.f32 %v871_v21  ;;  %2326 = vmatmul.mubr.msk.f32.vlgmr.msra.gmra.mxu1 %vm150_vm1, %v887_v20 }
 0x35c   :  { %v2438_v22 = vpop.eup %2437  ;;  %2329 = vmatpush3.msra.mxu1 %v2596_v28  ;;  %2330 = vmatprep.mubr.msk.f32.mxu1 %vm2480_vm0, %v2479_v24 }
 0x35d   :  { %2333 = vmatprep.subr.mxu1 %v2479_v24  ;;  %v888_v23 = vmul.f32 %v2438_v22, %v2422_v58 }
 0x35e   :  { %v874_v25 = vpop.xlane.xlu1 %873 }
 0x35f   :  { %2445 = vrcp.f32 %v874_v25  ;;  %2331 = vmatmul.mubr.msk.f32.vlgmr.msra.gmra.mxu1 %vm150_vm1, %v888_v23  ;;  %v1870_v23 = vld [vmem:[%s2801_s1 + $0xb8] sm:$0xff]  ;;  %v1869_v25 = vld [vmem:[%s2801_s1 + $0xb0] sm:$0xff] }
 0x360   :  { %v2440_v26 = vpop.eup %2439  ;;  %2334 = vmatpush3.msra.mxu1 %v2593_v27  ;;  %2335 = vmatprep.mubr.msk.f32.mxu1 %vm2480_vm0, %v2479_v24 }
 0x361   :  { %2338 = vmatprep.subr.mxu1 %v2479_v24  ;;  %v889_v29 = vmul.f32 %v2440_v26, %v2424_v63  ;;  %v1868_v26 = vld [vmem:[%s2801_s1 + $0xa8] sm:$0xff] }
 0x362   :  { %v877_v28 = vpop.xlane.xlu0 %876  ;;  %v1816_v12 = vpop.permute.xlu1 %1815 }
 0x363   :  { %2447 = vrcp.f32 %v877_v28  ;;  %2336 = vmatmul.mubr.msk.f32.vlgmr.msra.gmra.mxu1 %vm150_vm1, %v889_v29  ;;  %v1867_v29 = vld [vmem:[%s2801_s1 + $0xa0] sm:$0xff]  ;;  %v1965_v28 = vld [vmem:[%s2801_s1 + $0xf8] sm:$0xff] }
 0x364   :  { %v2442_v33 = vpop.eup %2441  ;;  %2339 = vmatpush3.msra.mxu1 %v2603_v30  ;;  %2340 = vmatprep.mubr.msk.f32.mxu1 %vm2480_vm0, %v2479_v24 }
 0x365   :  { %2348 = vmatprep.subr.mxu1 %v2479_v24  ;;  %v890_v34 = vmul.f32 %v2442_v33, %v2426_v2  ;;  %v1964_v33 = vld [vmem:[%s2801_s1 + $0xf0] sm:$0xff] }
 0x367   :  { %2341 = vmatmul.mubr.msk.f32.vlgmr.msra.gmra.mxu1 %vm150_vm1, %v890_v34  ;;  %v1963_v34 = vld [vmem:[%s2801_s1 + $0xe8] sm:$0xff] }
 0x368   :  { %v2444_v27 = vpop.eup %2443  ;;  %2349 = vmatpush3.msra.mxu1 %v2610_v32  ;;  %2350 = vmatprep.mubr.msk.f32.mxu1 %vm2480_vm0, %v2479_v24  ;;  %v1479_v32 = vld [vmem:[%s2801_s1 + $0x88] sm:$0xff] }
 0x369   :  { %v891_v35 = vmul.f32 %v2444_v27, %v2428_v5  ;;  %2358 = vmatprep.subr.mxu1 %v1479_v32  ;;  %v1962_v27 = vld [vmem:[%s2801_s1 + $0xe0] sm:$0xff] }
 0x36b   :  { %2346 = vmatmul.mubr.msk.f32.vlgmr.msra.gmra.mxu0 %vm150_vm1, %v891_v35 }
 0x36c   :  { %v2446_v36 = vpop.eup %2445  ;;  %2354 = vmatpush3.msra.mxu0 %v2607_v31  ;;  %2355 = vmatprep.mubr.msk.f32.mxu0 %vm2480_vm0, %v2479_v24  ;;  %v1478_v31 = vld [vmem:[%s2801_s1 + $0x80] sm:$0xff]  ;;  %v1481_v24 = vld [vmem:[%s2801_s1 + $0x98] sm:$0xff] }
 0x36d   :  { %v892_v30 = vmul.f32 %v2446_v36, %v2430_v7  ;;  %2363 = vmatprep.subr.mxu0 %v1481_v24 }
 0x36f   :  { %2351 = vmatmul.mubr.msk.f32.vlgmr.msra.gmra.mxu1 %vm150_vm1, %v892_v30 }
 0x370   :  { %v2448_v37 = vpop.eup %2447  ;;  %2359 = vmatpush3.msra.mxu1 %v1479_v32 }
 0x371   :  { %v893_v38 = vmul.f32 %v2448_v37, %v2432_v9  ;;  %2368 = vmatprep.subr.mxu1 %v1478_v31  ;;  %v1818_v9 = vpop.permute.xlu0 %1817 }
 0x373   :  { %2356 = vmatmul.mubr.msk.f32.vlgmr.msra.gmra.mxu0 %vm150_vm1, %v893_v38 }
 0x374   :  { %2364 = vmatpush3.msra.mxu0 %v1481_v24 }
 0x375   :  { %2373 = vmatprep.subr.mxu0 %v1480_v39 }
 0x417   :  { %v963_v40 = vpop.f32.mrf.mxu1 }
 0x419   :  { %v2322_v41 = vpop.f32.mrf.mxu1 }
 0x41b   :  { %v1036_v42 = vpop.f32.mrf.mxu1 }
 0x41d   :  { %v2327_v43 = vpop.f32.mrf.mxu1 }
 0x41f   :  { %v1109_v44 = vpop.f32.mrf.mxu1 }
 0x420   :  { %2360 = vmatprep.mubr.msk.f32.mxu1 %vm150_vm1, %v1109_v44 }
 0x421   :  { %v2332_v45 = vpop.f32.mrf.mxu1 }
 0x422   :  { %v1857_v45 = vsub.s32 1, %v2728_v57 }
 0x423   :  { %v1182_v46 = vpop.f32.mrf.mxu1 }
 0x424   :  { %2361 = vmatmul.mubr.msk.f32.vlgmr.msra.gmra.mxu1 %vm150_vm1, %v1182_v46 }
 0x425   :  { %v2337_v47 = vpop.f32.mrf.mxu1  ;;  %2370 = vmatprep.mubr.msk.f32.mxu1 %vm150_vm1, %v963_v40  ;;  %2369 = vmatpush3.msra.mxu1 %v1478_v31 }
 0x426   :  { %2378 = vmatprep.subr.mxu1 %v1870_v23 }
 0x427   :  { %v1255_v48 = vpop.f32.mrf.mxu1 }
 0x428   :  { %2371 = vmatmul.mubr.msk.f32.vlgmr.msra.gmra.mxu1 %vm150_vm1, %v1036_v42 }
 0x429   :  { %v2342_v17 = vpop.f32.mrf.mxu1  ;;  %2379 = vmatpush3.msra.mxu1 %v1870_v23 }
 0x42a   :  { %2380 = vmatprep.subr.mxu1 %v1869_v25  ;;  %v1863_v17 = vsub.s32 2, %v2728_v57 }
 0x42b   :  { %v1328_v4 = vpop.f32.mrf.mxu0  ;;  %2381 = vmatpush3.msra.mxu1 %v1869_v25 }
 0x42c   :  { %2382 = vmatprep.subr.mxu1 %v1868_v26 }
 0x42d   :  { %v2347_v49 = vpop.f32.mrf.mxu0  ;;  %2383 = vmatpush3.msra.mxu1 %v1868_v26 }
 0x42e   :  { %2384 = vmatprep.subr.mxu1 %v1867_v29 }
 0x42f   :  { %v1401_v50 = vpop.f32.mrf.mxu1  ;;  %2385 = vmatpush3.msra.mxu1 %v1867_v29 }
 0x430   :  { %2365 = vmatprep.mubr.msk.f32.mxu0 %vm150_vm1, %v1401_v50 }
 0x431   :  { %v2352_v51 = vpop.f32.mrf.mxu1 }
 0x433   :  { %v1474_v52 = vpop.f32.mrf.mxu0 }
 0x434   :  { %2366 = vmatmul.mubr.msk.f32.vlgmr.msra.gmra.mxu0 %vm150_vm1, %v1474_v52 }
 0x435   :  { %2374 = vmatpush3.msra.mxu0 %v1480_v39  ;;  %v2357_v53 = vpop.f32.mrf.mxu0  ;;  %2375 = vmatprep.mubr.msk.f32.mxu0 %vm150_vm1, %v1255_v48  ;;  %v1858_v48 = vrot.slane %v2734_v62, %v1857_v45 }
 0x436   :  { %2389 = vmatprep.subr.mxu0 %v1965_v28  ;;  %v1864_v53 = vrot.slane %v2734_v62, %v1863_v17 }
 0x438   :  { %2376 = vmatmul.mubr.msk.f32.vlgmr.msra.gmra.mxu0 %vm150_vm1, %v1328_v4 }
 0x439   :  { %2390 = vmatpush3.msra.mxu0 %v1965_v28 }
 0x43a   :  { %2391 = vmatprep.subr.mxu0 %v1964_v33 }
 0x43b   :  { %2392 = vmatpush3.msra.mxu0 %v1964_v33 }
 0x43c   :  { %2393 = vmatprep.subr.mxu0 %v1963_v34 }
 0x43d   :  { %2394 = vmatpush3.msra.mxu0 %v1963_v34 }
 0x43e   :  { %2395 = vmatprep.subr.mxu0 %v1962_v27 }
 0x43f   :  { %2396 = vmatpush3.msra.mxu0 %v1962_v27 }
 0x4e4   :  { %v2362_v54 = vpop.f32.mrf.mxu1 }
 0x4e6   :  { %v1555_v56 = vpop.f32.mrf.mxu1 }
 0x4e8   :  { %v2372_v58 = vpop.f32.mrf.mxu1 }
 0x4e9   :  { %v1723_v1 = vadd.f32 %v2372_v58, %v2362_v54  ;;  %v1961_v58 = vld [vmem:[%s2801_s1 + $0xd8] sm:$0xff] }
 0x4ea   :  { %v1717_v63 = vpop.f32.mrf.mxu1  ;;  %2397 = vmatprep.subr.mxu0 %v1961_v58 }
 0x4eb   :  { %v1718_v6 = vadd.f32 %v1717_v63, %v1555_v56  ;;  %2398 = vmatpush3.msra.mxu0 %v1961_v58  ;;  %v1873_v63 = vsub.s32 3, %v2728_v57 }
 0x4f4   :  { %v2367_v59 = vpop.f32.mrf.mxu0 }
 0x4f6   :  { %v1636_v61 = vpop.f32.mrf.mxu0 }
 0x4f8   :  { %v2377_v0 = vpop.f32.mrf.mxu0 }
 0x4f9   :  { %v1804_v2 = vadd.f32 %v2377_v0, %v2367_v59  ;;  %v1960_v59 = vld [vmem:[%s2801_s1 + $0xd0] sm:$0xff]  ;;  %v1874_v0 = vrot.slane %v2734_v62, %v1873_v63 }
 0x4fa   :  { %v1798_v5 = vpop.f32.mrf.mxu0  ;;  %2399 = vmatprep.subr.mxu0 %v1960_v59 }
 0x4fb   :  { %v1808_v7 = vadd.f32 %v1804_v2, %v1723_v1  ;;  %v1799_v8 = vadd.f32 %v1798_v5, %v1636_v61  ;;  %2400 = vmatpush3.msra.mxu0 %v1960_v59  ;;  %v1958_v61 = vld [vmem:[%s2801_s1 + $0xc0] sm:$0xff]  ;;  %s2485_s1 = smov [#allocation2]  }
 0x4fc   :  { %2401 = vmatprep.subr.mxu0 %v1959_v60  ;;  %s2103_s9 = sshll.u32 %s2485_s1, 4  ;;  %s2104_s9 = int_to_ptr.vmem [resolvable:$true] %s2103_s9 }
 0x4fd   :  { %v1807_v10 = vadd.f32 %v1799_v8, %v1718_v6  ;;  %v1814_v11 = vadd.f32 %v1812_v3, %v1808_v7  ;;  %2402 = vmatpush3.msra.mxu0 %v1959_v60  ;;  %v1968_v8 = vsub.s32 4, %v2728_v57  ;;  %s2457_s10 = scalar_lea.vmem %s2104_s9, 256  ;;  %p2462_p1 = scmp.lt.s32.totalorder %s2104_s9, %s2104_s9 }
 0x4fe   :  { %2403 = vmatprep.subr.mxu0 %v1958_v61  ;;  %p2458_p0 = scmp.ne.s32.totalorder %s2104_s9, %s2457_s10  ;;  %p2463_p2 = scmp.lt.s32.totalorder %s2457_s10, %s2457_s10 }
 0x4ff   :  { %v1822_v13 = vadd.f32 %v1818_v9, %v1814_v11  ;;  %v1813_v14 = vadd.f32 %v1812_v3, %v1807_v10  ;;  %2404 = vmatpush3.msra.mxu0 %v1958_v61  ;;  %v1969_v9 = vrot.slane %v2734_v62, %v1968_v8 }
 0x500   :  { %p2464_p3 = por %p2463_p2, %p2462_p1 }
 0x501   :  { %v1821_v15 = vadd.f32 %v1816_v12, %v1813_v14  ;;  %v1827_v16 = vsel %vm1823_vm2, %v1822_v13, 0.0  ;;  %v1834_v18 = vmul.f32 %v1822_v13, %v1822_v13 }
 0x502   :  { %1828 = vadd.xlane.f32.xlu0 %v1827_v16  ;;  %p2465_p4 = pnand %p2464_p3, %p2458_p0 }
 0x503   :  { %v1824_v19 = vsel %vm1823_vm2, %v1821_v15, 0.0  ;;  %v1833_v20 = vmul.f32 %v1821_v15, %v1821_v15  ;;  %v1838_v21 = vsel %vm1823_vm2, %v1834_v18, 0.0 }
 0x504   :  { %1825 = vadd.xlane.f32.xlu1 %v1824_v19 }
 0x505   :  { %v1835_v22 = vsel %vm1823_vm2, %v1833_v20, 0.0 }
 0x506   :  { %1839 = vadd.xlane.f32.xlu0 %v1838_v21 }
 0x508   :  { %1836 = vadd.xlane.f32.xlu1 %v1835_v22 }
 0x58b   :  { %v1829_v35 = vpop.xlane.xlu0 %1828 }
 0x58c   :  { %v1832_v36 = vmul.f32 0.03125, %v1829_v35 }
 0x58d   :  { %v1826_v30 = vpop.xlane.xlu1 %1825 }
 0x58e   :  { %v1831_v37 = vmul.f32 0.03125, %v1826_v30  ;;  %v1844_v32 = vmul.f32 %v1832_v36, %v1832_v36  ;;  %v1848_v46 = vsub.f32 %v1822_v13, %v1832_v36 }
 0x58f   :  { %v1840_v38 = vpop.xlane.xlu0 %1839 }
 0x590   :  { %v1842_v31 = vmul.f32 0.03125, %v1840_v38  ;;  %v1843_v39 = vmul.f32 %v1831_v37, %v1831_v37  ;;  %v1847_v4 = vsub.f32 %v1821_v15, %v1831_v37 }
 0x591   :  { %v1837_v24 = vpop.xlane.xlu1 %1836 }
 0x592   :  { %v1846_v40 = vsub.f32 %v1842_v31, %v1844_v32  ;;  %v1841_v41 = vmul.f32 0.03125, %v1837_v24  ;;  %v2086_v31 = vsub.s32 5, %v2728_v57  ;;  %v2092_v24 = vsub.s32 6, %v2728_v57 }
 0x594   :  { %v1850_v42 = vadd.f32 1e-05, %v1846_v40  ;;  %v1845_v43 = vsub.f32 %v1841_v41, %v1843_v39  ;;  %v2087_v40 = vrot.slane %v2734_v62, %v2086_v31 }
 0x596   :  { %2449 = vrsqrt.f32 %v1850_v42  ;;  %v1849_v44 = vadd.f32 1e-05, %v1845_v43 }
 0x598   :  { %2451 = vrsqrt.f32 %v1849_v44  ;;  %v2093_v44 = vrot.slane %v2734_v62, %v2092_v24 }
 0x5a3   :  { %v2450_v47 = vpop.eup %2449 }
 0x5a4   :  { %v1854_v49 = vmul.f32 %v2450_v47, %v1848_v46 }
 0x5a5   :  { %v2452_v50 = vpop.eup %2451 }
 0x5a6   :  { %v1853_v51 = vmul.f32 %v2452_v50, %v1847_v4  ;;  %v1860_v52 = vmul.f32 %v1858_v48, %v1854_v49 }
 0x5a8   :  { %v1859_v54 = vmul.f32 %v1858_v48, %v1853_v51  ;;  %v1866_v56 = vadd.f32 %v1864_v53, %v1860_v52 }
 0x5aa   :  { %v1865_v55 = vadd.f32 %v1864_v53, %v1859_v54 }
 0x5ac   :  { %2386 = vmatprep.mubr.msk.f32.mxu1 %vm1823_vm2, %v1865_v55 }
 0x5ad   :  { %2387 = vmatmul.mubr.msk.f32.vlgmr.msra.gmra.mxu1 %vm1823_vm2, %v1866_v56 }
 0x66d   :  { %v2388_v1 = vpop.f32.mrf.mxu1 }
 0x66e   :  { %v1953_v2 = vadd.f32 %v2388_v1, %v1874_v0 }
 0x66f   :  { %v1947_v3 = vpop.f32.mrf.mxu1 }
 0x670   :  { %v1948_v5 = vadd.f32 %v1947_v3, %v1874_v0  ;;  %v1957_v7 = vmax.f32 %v1953_v2, 0.0 }
 0x672   :  { %v1956_v6 = vmax.f32 %v1948_v5, 0.0 }
 0x674   :  { %2405 = vmatprep.mubr.msk.f32.mxu0 %vm1970_vm3, %v1956_v6 }
 0x675   :  { %2406 = vmatmul.mubr.msk.f32.vlgmr.msra.gmra.mxu0 %vm1970_vm3, %v1957_v7 }
 0x735   :  { %v2407_v10 = vpop.f32.mrf.mxu0 }
 0x736   :  { %v2049_v11 = vadd.f32 %v2407_v10, %v1969_v9 }
 0x737   :  { %v2043_v12 = vpop.f32.mrf.mxu0 }
 0x738   :  { %v2053_v13 = vadd.f32 %v2049_v11, %v1866_v56  ;;  %v2044_v14 = vadd.f32 %v2043_v12, %v1969_v9 }
 0x73a   :  { %v2052_v15 = vadd.f32 %v2044_v14, %v1865_v55  ;;  %v2057_v16 = vsel %vm1823_vm2, %v2053_v13, 0.0  ;;  %v2063_v18 = vmul.f32 %v2053_v13, %v2053_v13 }
 0x73b   :  { %2058 = vadd.xlane.f32.xlu0 %v2057_v16 }
 0x73c   :  { %v2054_v19 = vsel %vm1823_vm2, %v2052_v15, 0.0  ;;  %v2062_v20 = vmul.f32 %v2052_v15, %v2052_v15  ;;  %v2067_v21 = vsel %vm1823_vm2, %v2063_v18, 0.0 }
 0x73d   :  { %2055 = vadd.xlane.f32.xlu1 %v2054_v19 }
 0x73e   :  { %v2064_v22 = vsel %vm1823_vm2, %v2062_v20, 0.0 }
 0x73f   :  { %2068 = vadd.xlane.f32.xlu0 %v2067_v21 }
 0x741   :  { %2065 = vadd.xlane.f32.xlu1 %v2064_v22 }
 0x7c4   :  { %v2059_v23 = vpop.xlane.xlu0 %2058 }
 0x7c5   :  { %v2061_v25 = vmul.f32 0.03125, %v2059_v23 }
 0x7c6   :  { %v2056_v26 = vpop.xlane.xlu1 %2055 }
 0x7c7   :  { %v2060_v29 = vmul.f32 0.03125, %v2056_v26  ;;  %v2073_v33 = vmul.f32 %v2061_v25, %v2061_v25  ;;  %v2077_v39 = vsub.f32 %v2053_v13, %v2061_v25 }
 0x7c8   :  { %v2069_v28 = vpop.xlane.xlu0 %2068 }
 0x7c9   :  { %v2071_v34 = vmul.f32 0.03125, %v2069_v28  ;;  %v2072_v35 = vmul.f32 %v2060_v29, %v2060_v29  ;;  %v2076_v42 = vsub.f32 %v2052_v15, %v2060_v29 }
 0x7ca   :  { %v2066_v27 = vpop.xlane.xlu1 %2065 }
 0x7cb   :  { %v2075_v36 = vsub.f32 %v2071_v34, %v2073_v33  ;;  %v2070_v30 = vmul.f32 0.03125, %v2066_v27 }
 0x7cd   :  { %v2079_v37 = vadd.f32 1e-05, %v2075_v36  ;;  %v2074_v38 = vsub.f32 %v2070_v30, %v2072_v35 }
 0x7cf   :  { %2453 = vrsqrt.f32 %v2079_v37  ;;  %v2078_v32 = vadd.f32 1e-05, %v2074_v38 }
 0x7d1   :  { %2455 = vrsqrt.f32 %v2078_v32 }
 0x7dc   :  { %v2454_v41 = vpop.eup %2453 }
 0x7dd   :  { %v2083_v43 = vmul.f32 %v2454_v41, %v2077_v39 }
 0x7de   :  { %v2456_v45 = vpop.eup %2455 }
 0x7df   :  { %v2082_v46 = vmul.f32 %v2456_v45, %v2076_v42  ;;  %v2089_v47 = vmul.f32 %v2087_v40, %v2083_v43 }
 0x7e1   :  { %v2088_v48 = vmul.f32 %v2087_v40, %v2082_v46  ;;  %v2095_v17 = vadd.f32 %v2093_v44, %v2089_v47 }
 0x7e3   :  { %v2094_v4 = vadd.f32 %v2093_v44, %v2088_v48  ;;  %2097 = vst.msk [vmem:[#allocation2 + $0x8] sm:$0xff] %vm1823_vm2, %v2095_v17 }
 0x7e5   :  { %2096 = vst.msk [vmem:[#allocation2] sm:$0xff] %vm1823_vm2, %v2094_v4 }
 0x7e6   :  { %2468 = shalt.err (!%p2465_p4)
}
 0x7e7   :  { %s2486_s11 = smov 128   ;;  %s2487_s12 = smov 8  }
 0x7e8   :  { %2109 = dma.vmem_to_hbm [thread:$0]  %s2104_s9, 256, %s2802_s2, [#allocation3], %s2486_s11, %s2486_s11, %s2487_s12  }
 0x7e9   :  { %2477 = dma.done.wait [#allocation3], 256  }
 0x7ea   :  { %2478 = vsyncadd [#allocation3], 4294967040 }
 0x7eb   :  { %2113 = vsyncpa [#allocation3], 1 }

</bundles_post_ra>
